<compile_context>
chip_gen: v7x
topology: tpu7x:2x2x1
jax: 0.10.0
libtpu: 0.0.40
codegen_flags: <defaults>
</compile_context>

<pallas_src>
import functools

import jax
import jax.numpy as jnp
from jax.experimental import pallas as pl
from jax.experimental.pallas import tpu as pltpu

_LANE = 128            # TPU vreg lane width
_SUBLANE = 8           # f32 sublane count
_MIN_PALLAS_BATCH = 64 # below this, plain XLA has lower latency than pallas_call


def _round_up(x: int, m: int) -> int:
    return (x + m - 1) // m * m


def _policy_fwd_kernel(obs_ref, w1_ref, b1_ref, w2_ref, b2_ref, w3_ref, b3_ref,
                       out_ref):
    """Fused MLP forward: (Linear->ReLU) x2 -> Linear -> Tanh, all in VMEM."""
    x = obs_ref[...]
    h = jnp.dot(x, w1_ref[...], preferred_element_type=jnp.float32) + b1_ref[...]
    h = jnp.maximum(h, 0.0)
    h = jnp.dot(h, w2_ref[...], preferred_element_type=jnp.float32) + b2_ref[...]
    h = jnp.maximum(h, 0.0)
    a = jnp.dot(h, w3_ref[...], preferred_element_type=jnp.float32) + b3_ref[...]
    out_ref[...] = jnp.tanh(a).astype(out_ref.dtype)


@functools.partial(jax.jit, static_argnames=("tile_b", "single_step_max_b"))
def deterministic_policy_forward(obs, w1, b1, w2, b2, w3, b3, *,
                                 tile_b=512, single_step_max_b=4096):
    """Pallas equivalent of DeterministicPolicy.forward(obs).

    obs: (B, state_dim) f32.  Weights w_i: (in, out), biases b_i: (1, out).
    Returns (B, act_dim) f32 in (-1, 1).
    """
    B, state_dim = obs.shape
    hidden = w1.shape[1]
    act_dim = w3.shape[1]

    # Lane-dense output: pad the last Linear's output dim from act_dim (e.g. 6)
    # up to a multiple of 128 lanes so every output tile store is an unmasked
    # `vst`.  The extra zero columns are free on the MXU (N is padded to 128
    # internally anyway); the wrapper slices them off at the end.
    n_out = _round_up(act_dim, _LANE)
    w3p = jnp.pad(w3, ((0, 0), (0, n_out - act_dim)))
    b3p = jnp.pad(b3, ((0, 0), (0, n_out - act_dim)))

    if B <= single_step_max_b:
        # Single grid step: whole (sublane-padded) batch as one block.  Even at
        # B=4096 the footprint (obs + hidden acts + out + weights) is ~10 MiB,
        # well under the default scoped VMEM on v5e/v6e/v7x, and it eliminates
        # all per-grid-step pipeline overhead.
        tile = _round_up(B, _SUBLANE)
        b_pad = tile
        grid = (1,)
        semantics = ("arbitrary",)   # nothing worth sharding across TCs for 1 step
    else:
        # Huge batch: big MXU-friendly tile (multiple of 256 fills the v6e/v7x
        # 256-row MXU; also a multiple of 128 for v5e) and shard grid steps
        # across TensorCores.
        tile = tile_b
        b_pad = _round_up(B, tile_b)
        grid = (b_pad // tile_b,)
        semantics = ("parallel",)

    if b_pad != B:
        # Only pays an extra HBM round-trip for ragged batches; choose a tile
        # that divides B (or a sublane-aligned B) to avoid it entirely.
        obs = jnp.pad(obs, ((0, b_pad - B), (0, 0)))

    const = lambda i: (0, 0)  # weights/biases: same (full) block every grid step
    # NOTE: all weights/biases total < 0.3 MiB at hidden=256, so the default
    # 2-deep buffering of these constant blocks is negligible.  If hidden_dim is
    # ever raised substantially, add pipeline_mode=pl.Buffered(1) to them.

    out = pl.pallas_call(
        _policy_fwd_kernel,
        out_shape=jax.ShapeDtypeStruct((b_pad, n_out), jnp.float32),
        grid=grid,
        in_specs=[
            pl.BlockSpec((tile, state_dim), lambda i: (i, 0)),  # obs tile
            pl.BlockSpec((state_dim, hidden), const),           # W1
            pl.BlockSpec((1, hidden), const),                   # b1
            pl.BlockSpec((hidden, hidden), const),              # W2
            pl.BlockSpec((1, hidden), const),                   # b2
            pl.BlockSpec((hidden, n_out), const),               # W3 (lane-padded)
            pl.BlockSpec((1, n_out), const),                    # b3 (lane-padded)
        ],
        out_specs=pl.BlockSpec((tile, n_out), lambda i: (i, 0)),
        compiler_params=pltpu.CompilerParams(dimension_semantics=semantics),
    )(obs, w1, b1, w2, b2, w3p, b3p)

    return out[:B, :act_dim]


@jax.jit
def _xla_forward(obs, w1, b1, w2, b2, w3, b3):
    """Plain-XLA path for tiny batches (B=1 act(), etc.)."""
    h = jnp.maximum(obs @ w1 + b1, 0.0)
    h = jnp.maximum(h @ w2 + b2, 0.0)
    return jnp.tanh(h @ w3 + b3)


def _ref_forward(obs, w1, b1, w2, b2, w3, b3):
    """High-precision reference for the self-test."""
    hp = jax.lax.Precision.HIGHEST
    h = jnp.maximum(jnp.dot(obs, w1, precision=hp) + b1, 0.0)
    h = jnp.maximum(jnp.dot(h, w2, precision=hp) + b2, 0.0)
    return jnp.tanh(jnp.dot(h, w3, precision=hp) + b3)


class DeterministicPolicy:
    """JAX/Pallas mirror of the PyTorch DeterministicPolicy module."""

    def __init__(self, state_dim: int, act_dim: int, max_action: float,
                 hidden_dim: int = 256, n_hidden: int = 2, *, key):
        if n_hidden != 2:
            # TODO(synk): fused kernel is written for exactly 3 Linear layers (n_hidden=2).
            raise NotImplementedError("fused kernel supports n_hidden=2 only")
        self.max_action = float(max_action)

        dims = [state_dim, hidden_dim, hidden_dim, act_dim]
        keys = jax.random.split(key, 2 * (len(dims) - 1))
        params = []
        for li, (d_in, d_out) in enumerate(zip(dims[:-1], dims[1:])):
            # Same init family as torch.nn.Linear default (Kaiming-uniform bound).
            bound = 1.0 / jnp.sqrt(jnp.asarray(d_in, jnp.float32))
            w = jax.random.uniform(keys[2 * li], (d_in, d_out), jnp.float32,
                                   -bound, bound)
            b = jax.random.uniform(keys[2 * li + 1], (1, d_out), jnp.float32,
                                   -bound, bound)
            params += [w, b]
        (self.w1, self.b1, self.w2, self.b2, self.w3, self.b3) = params

    def _params(self):
        return (self.w1, self.b1, self.w2, self.b2, self.w3, self.b3)

    def __call__(self, obs: jax.Array, *, use_pallas=None) -> jax.Array:
        if use_pallas is None:
            use_pallas = obs.shape[0] >= _MIN_PALLAS_BATCH
        if use_pallas:
            return deterministic_policy_forward(obs, *self._params())
        return _xla_forward(obs, *self._params())

    def act(self, state) -> jax.Array:
        # B=1: Pallas launch overhead exceeds the whole MLP cost; use XLA path.
        state = jnp.asarray(state, jnp.float32).reshape(1, -1)
        a = self(state, use_pallas=False) * self.max_action
        return jnp.clip(a, -self.max_action, self.max_action).reshape(-1)


if __name__ == "__main__":
    # HalfCheetah-like small shapes: state_dim=17, act_dim=6, hidden=256.
    key = jax.random.PRNGKey(0)
    k_obs, k_obs2, k_policy = jax.random.split(key, 3)

    state_dim, act_dim, hidden_dim = 17, 6, 256
    policy = DeterministicPolicy(state_dim, act_dim, max_action=1.0,
                                 hidden_dim=hidden_dim, n_hidden=2, key=k_policy)

    # 1) Fused Pallas kernel, single-grid-step path (batch=16).
    batch = 16
    obs = jax.random.normal(k_obs, (batch, state_dim), jnp.float32)
    out = deterministic_policy_forward(obs, *policy._params())
    jax.block_until_ready(out)
    expected = _ref_forward(obs, *policy._params())
    assert out.shape == (batch, act_dim), out.shape
    assert out.dtype == jnp.float32
    assert bool(jnp.allclose(out, expected, rtol=2e-3, atol=2e-3)), (
        float(jnp.max(jnp.abs(out - expected))))

    # 2) Tiled path: ragged batch (200 -> padded 256), 2 grid steps of 128 rows.
    batch2 = 200
    obs2 = jax.random.normal(k_obs2, (batch2, state_dim), jnp.float32)
    out2 = deterministic_policy_forward(obs2, *policy._params(),
                                        tile_b=128, single_step_max_b=0)
    jax.block_until_ready(out2)
    expected2 = _ref_forward(obs2, *policy._params())
    assert out2.shape == (batch2, act_dim), out2.shape
    assert bool(jnp.allclose(out2, expected2, rtol=2e-3, atol=2e-3)), (
        float(jnp.max(jnp.abs(out2 - expected2))))

    # 3) Small-batch dispatch (XLA path) and act() (B=1, max_action scale/clamp).
    out3 = policy(obs)                 # B=16 < 64 -> XLA path
    jax.block_until_ready(out3)
    assert bool(jnp.allclose(out3, expected, rtol=2e-3, atol=2e-3))
    a = policy.act(obs[0])
    jax.block_until_ready(a)
    assert a.shape == (act_dim,)

    print("KERNEL_OK")
</pallas_src>

<mosaic_0001>
module attributes {stable_mosaic.version = 11 : i64} {
  func.func @_policy_fwd_kernel(%arg0: i32, %arg1: memref<16x17xf32, #tpu.memory_space<vmem>>, %arg2: memref<17x256xf32, #tpu.memory_space<vmem>>, %arg3: memref<1x256xf32, #tpu.memory_space<vmem>>, %arg4: memref<256x256xf32, #tpu.memory_space<vmem>>, %arg5: memref<1x256xf32, #tpu.memory_space<vmem>>, %arg6: memref<256x128xf32, #tpu.memory_space<vmem>>, %arg7: memref<1x128xf32, #tpu.memory_space<vmem>>, %arg8: memref<16x128xf32, #tpu.memory_space<vmem>>) attributes {dimension_semantics = [#tpu.dimension_semantics<arbitrary>], iteration_bounds = array<i64: 1>, scalar_prefetch = 0 : i64, scratch_operands = 0 : i64, tpu.core_type = #tpu.core_type<tc>, window_params = [{transform_indices = @transform_0, window_bounds = array<i64: 16, 17>}, {pipeline_mode = #tpu.pipeline_mode<synchronous>, transform_indices = @transform_1, window_bounds = array<i64: 17, 256>}, {pipeline_mode = #tpu.pipeline_mode<synchronous>, transform_indices = @transform_2, window_bounds = array<i64: 1, 256>}, {pipeline_mode = #tpu.pipeline_mode<synchronous>, transform_indices = @transform_3, window_bounds = array<i64: 256, 256>}, {pipeline_mode = #tpu.pipeline_mode<synchronous>, transform_indices = @transform_4, window_bounds = array<i64: 1, 256>}, {pipeline_mode = #tpu.pipeline_mode<synchronous>, transform_indices = @transform_5, window_bounds = array<i64: 256, 128>}, {pipeline_mode = #tpu.pipeline_mode<synchronous>, transform_indices = @transform_6, window_bounds = array<i64: 1, 128>}, {transform_indices = @transform_7, window_bounds = array<i64: 16, 128>}]} {
    %c0 = arith.constant 0 : index
    %c0_0 = arith.constant 0 : index
    %0 = vector.load %arg1[%c0, %c0_0] : memref<16x17xf32, #tpu.memory_space<vmem>>, vector<16x17xf32>
    %c0_1 = arith.constant 0 : index
    %c0_2 = arith.constant 0 : index
    %1 = vector.load %arg2[%c0_1, %c0_2] : memref<17x256xf32, #tpu.memory_space<vmem>>, vector<17x256xf32>
    %cst = arith.constant dense<0.000000e+00> : vector<16x256xf32>
    %2 = tpu.matmul %0, %1, %cst {dimension_numbers = #tpu.dot_dimension_numbers<[1], [0], [0], [1], [0, 0, 1, 1], [], []>} : vector<16x17xf32>, vector<17x256xf32>, vector<16x256xf32> -> vector<16x256xf32>
    %c0_3 = arith.constant 0 : index
    %c0_4 = arith.constant 0 : index
    %3 = vector.load %arg3[%c0_3, %c0_4] : memref<1x256xf32, #tpu.memory_space<vmem>>, vector<1x256xf32>
    %4 = vector.broadcast %3 : vector<1x256xf32> to vector<16x256xf32>
    %5 = arith.addf %2, %4 : vector<16x256xf32>
    %cst_5 = arith.constant 0.000000e+00 : f32
    %6 = vector.broadcast %cst_5 : f32 to vector<16x256xf32>
    %7 = arith.maximumf %5, %6 : vector<16x256xf32>
    %c0_6 = arith.constant 0 : index
    %c0_7 = arith.constant 0 : index
    %8 = vector.load %arg4[%c0_6, %c0_7] : memref<256x256xf32, #tpu.memory_space<vmem>>, vector<256x256xf32>
    %cst_8 = arith.constant dense<0.000000e+00> : vector<16x256xf32>
    %9 = tpu.matmul %7, %8, %cst_8 {dimension_numbers = #tpu.dot_dimension_numbers<[1], [0], [0], [1], [0, 0, 1, 1], [], []>} : vector<16x256xf32>, vector<256x256xf32>, vector<16x256xf32> -> vector<16x256xf32>
    %c0_9 = arith.constant 0 : index
    %c0_10 = arith.constant 0 : index
    %10 = vector.load %arg5[%c0_9, %c0_10] : memref<1x256xf32, #tpu.memory_space<vmem>>, vector<1x256xf32>
    %11 = vector.broadcast %10 : vector<1x256xf32> to vector<16x256xf32>
    %12 = arith.addf %9, %11 : vector<16x256xf32>
    %cst_11 = arith.constant 0.000000e+00 : f32
    %13 = vector.broadcast %cst_11 : f32 to vector<16x256xf32>
    %14 = arith.maximumf %12, %13 : vector<16x256xf32>
    %c0_12 = arith.constant 0 : index
    %c0_13 = arith.constant 0 : index
    %15 = vector.load %arg6[%c0_12, %c0_13] : memref<256x128xf32, #tpu.memory_space<vmem>>, vector<256x128xf32>
    %cst_14 = arith.constant dense<0.000000e+00> : vector<16x128xf32>
    %16 = tpu.matmul %14, %15, %cst_14 {dimension_numbers = #tpu.dot_dimension_numbers<[1], [0], [0], [1], [0, 0, 1, 1], [], []>} : vector<16x256xf32>, vector<256x128xf32>, vector<16x128xf32> -> vector<16x128xf32>
    %c0_15 = arith.constant 0 : index
    %c0_16 = arith.constant 0 : index
    %17 = vector.load %arg7[%c0_15, %c0_16] : memref<1x128xf32, #tpu.memory_space<vmem>>, vector<1x128xf32>
    %18 = vector.broadcast %17 : vector<1x128xf32> to vector<16x128xf32>
    %19 = arith.addf %16, %18 : vector<16x128xf32>
    %20 = math.tanh %19 : vector<16x128xf32>
    %c0_17 = arith.constant 0 : index
    %c0_18 = arith.constant 0 : index
    %21 = vector.load %arg8[%c0_17, %c0_18] : memref<16x128xf32, #tpu.memory_space<vmem>>, vector<16x128xf32>
    tpu.vector_store %arg8[%c0_17, %c0_18], %20 {strides = array<i32>} : memref<16x128xf32, #tpu.memory_space<vmem>>, vector<16x128xf32>,
    return
  }
  func.func @transform_0(%arg0: i32) -> (i32, i32) {
    %c0_i32 = arith.constant 0 : i32
    %c0_i32_0 = arith.constant 0 : i32
    return %arg0, %c0_i32 : i32, i32
  }
  func.func @transform_1(%arg0: i32) -> (i32, i32) {
    %c0_i32 = arith.constant 0 : i32
    %c0_i32_0 = arith.constant 0 : i32
    %c0_i32_1 = arith.constant 0 : i32
    return %c0_i32, %c0_i32_0 : i32, i32
  }
  func.func @transform_2(%arg0: i32) -> (i32, i32) {
    %c0_i32 = arith.constant 0 : i32
    %c0_i32_0 = arith.constant 0 : i32
    %c0_i32_1 = arith.constant 0 : i32
    return %c0_i32, %c0_i32_0 : i32, i32
  }
  func.func @transform_3(%arg0: i32) -> (i32, i32) {
    %c0_i32 = arith.constant 0 : i32
    %c0_i32_0 = arith.constant 0 : i32
    %c0_i32_1 = arith.constant 0 : i32
    return %c0_i32, %c0_i32_0 : i32, i32
  }
  func.func @transform_4(%arg0: i32) -> (i32, i32) {
    %c0_i32 = arith.constant 0 : i32
    %c0_i32_0 = arith.constant 0 : i32
    %c0_i32_1 = arith.constant 0 : i32
    return %c0_i32, %c0_i32_0 : i32, i32
  }
  func.func @transform_5(%arg0: i32) -> (i32, i32) {
    %c0_i32 = arith.constant 0 : i32
    %c0_i32_0 = arith.constant 0 : i32
    %c0_i32_1 = arith.constant 0 : i32
    return %c0_i32, %c0_i32_0 : i32, i32
  }
  func.func @transform_6(%arg0: i32) -> (i32, i32) {
    %c0_i32 = arith.constant 0 : i32
    %c0_i32_0 = arith.constant 0 : i32
    %c0_i32_1 = arith.constant 0 : i32
    return %c0_i32, %c0_i32_0 : i32, i32
  }
  func.func @transform_7(%arg0: i32) -> (i32, i32) {
    %c0_i32 = arith.constant 0 : i32
    %c0_i32_0 = arith.constant 0 : i32
    return %arg0, %c0_i32 : i32, i32
  }
}

</mosaic_0001>

<bundles_post_ra>
// kernel: deterministic_policy_forward.1
= control target key start
LH: loop header
LB: loop body
LE: loop exit
PB: predicated region body
PF: predicated region fallthrough
CT: control target
= control target key end

     0   :  { %v568_v3 = vmov 0.0   ;;  %vm53_vm0 = vcmask 1040384   ;;  %vm46_vm1 = vcmask 138240   ;;  %s940_s1 = inlined_call_operand.vmem [shape: f32[17,256], index: 1, kind: input, shape index: {}]   ;;  %s941_s3 = inlined_call_operand.vmem [shape: f32[256,256], index: 3, kind: input, shape index: {}]   ;;  %s942_s0 = inlined_call_operand.vmem [shape: f32[16,17], index: 0, kind: input, shape index: {}]   ;;  %s943_s5 = inlined_call_operand.vmem [shape: f32[256,128], index: 5, kind: input, shape index: {}]   ;;  %s944_s2 = inlined_call_operand.vmem [shape: f32[1,256], index: 2, kind: input, shape index: {}]   ;;  %s945_s4 = inlined_call_operand.vmem [shape: f32[1,256], index: 4, kind: input, shape index: {}]   ;;  %s946_s6 = inlined_call_operand.vmem [shape: f32[1,128], index: 6, kind: input, shape index: {}]   ;;  %s947_s7 = inlined_call_operand.vmem [shape: f32[16,128], index: 7, kind: output, shape index: {}]  }
   0x1   :  { %v29_v0 = vld [vmem:[%s940_s1 + $0x8] sm:$0xff]  ;;  %v31_v1 = vld [vmem:[%s940_s1 + $0x18] sm:$0xff]  ;;  %v28_v2 = vld [vmem:[%s940_s1] sm:$0xff]  ;;  %124 = vmatprep.mubr.f32.mxu0 %v568_v3 }
   0x2   :  { %v463_v4 = vpack.c.bf16 %v31_v1, %v29_v0  ;;  %v30_v5 = vld [vmem:[%s940_s1 + $0x10] sm:$0xff]  ;;  %v33_v7 = vld [vmem:[%s940_s1 + $0x28] sm:$0x1]  ;;  %v32_v9 = vld [vmem:[%s940_s1 + $0x20] sm:$0x1] }
   0x3   :  { %v465_v6 = vpack.c.bf16 %v30_v5, %v28_v2  ;;  %v142_v8 = vld [vmem:[%s941_s3 + $0x8] sm:$0xff]  ;;  %v144_v10 = vld [vmem:[%s941_s3 + $0x18] sm:$0xff]  ;;  %v141_v11 = vld [vmem:[%s941_s3] sm:$0xff] }
   0x4   :  { %464 = vmatprep.subr.bf16.mxu0 %v463_v4  ;;  %v143_v12 = vld [vmem:[%s941_s3 + $0x10] sm:$0xff]  ;;  %v467_v13 = vpack.c.bf16 %v144_v10, %v142_v8  ;;  %v146_v15 = vld [vmem:[%s941_s3 + $0x28] sm:$0xff]  ;;  %v148_v16 = vld [vmem:[%s941_s3 + $0x38] sm:$0xff] }
   0x5   :  { %466 = vmatpush1.bf16.msra.mxu0 %v465_v6  ;;  %v469_v14 = vpack.c.bf16 %v143_v12, %v141_v11  ;;  %v145_v17 = vld [vmem:[%s941_s3 + $0x20] sm:$0xff]  ;;  %v471_v18 = vpack.c.bf16 %v148_v16, %v146_v15  ;;  %v147_v19 = vld [vmem:[%s941_s3 + $0x30] sm:$0xff]  ;;  %v150_v20 = vld [vmem:[%s941_s3 + $0x48] sm:$0xff] }
   0x6   :  { %420 = vmatprep.subr.msk.mxu0 %vm53_vm0, %v33_v7  ;;  %v152_v21 = vld [vmem:[%s941_s3 + $0x58] sm:$0xff]  ;;  %v26_v22 = vld [vmem:[%s942_s0] sm:$0xff]  ;;  %468 = vmatprep.subr.bf16.mxu1 %v467_v13  ;;  %v473_v23 = vpack.c.bf16 %v147_v19, %v145_v17  ;;  %v151_v26 = vld [vmem:[%s941_s3 + $0x50] sm:$0xff] }
   0x7   :  { %470 = vmatpush1.bf16.msra.mxu1 %v469_v14  ;;  %v475_v24 = vpack.c.bf16 %v152_v21, %v150_v20  ;;  %v149_v25 = vld [vmem:[%s941_s3 + $0x40] sm:$0xff]  ;;  %v154_v27 = vld [vmem:[%s941_s3 + $0x68] sm:$0xff]  ;;  %v156_v28 = vld [vmem:[%s941_s3 + $0x78] sm:$0xff] }
   0x8   :  { %472 = vmatprep.subr.bf16.mxu1 %v471_v18  ;;  %v27_v29 = vld [vmem:[%s942_s0 + $0x8] sm:$0xff]  ;;  %v477_v30 = vpack.c.bf16 %v151_v26, %v149_v25  ;;  %v479_v31 = vpack.c.bf16 %v156_v28, %v154_v27  ;;  %v153_v32 = vld [vmem:[%s941_s3 + $0x60] sm:$0xff]  ;;  %v155_v33 = vld [vmem:[%s941_s3 + $0x70] sm:$0xff] }
   0x9   :  { %421 = vmatpush1.msk.msra.mxu0 %vm53_vm0, %v32_v9  ;;  %v158_v34 = vld [vmem:[%s941_s3 + $0x88] sm:$0xff]  ;;  %v160_v35 = vld [vmem:[%s941_s3 + $0x98] sm:$0xff]  ;;  %v481_v36 = vpack.c.bf16 %v155_v33, %v153_v32  ;;  %v157_v38 = vld [vmem:[%s941_s3 + $0x80] sm:$0xff] }
   0xa   :  { %422 = vmatmul.mubr.msk.f32.vlgmr.msra.gmra.mrb[0].mxu0 %vm46_vm1, %v26_v22  ;;  %v483_v37 = vpack.c.bf16 %v160_v35, %v158_v34  ;;  %v159_v39 = vld [vmem:[%s941_s3 + $0x90] sm:$0xff]  ;;  %v162_v40 = vld [vmem:[%s941_s3 + $0xa8] sm:$0xff]  ;;  %v164_v41 = vld [vmem:[%s941_s3 + $0xb8] sm:$0xff] }
   0xb   :  { %130 = vmatprep.mubr.f32.mxu0 %v568_v3  ;;  %474 = vmatpush1.bf16.msra.mxu1 %v473_v23  ;;  %v485_v42 = vpack.c.bf16 %v159_v39, %v157_v38  ;;  %v487_v43 = vpack.c.bf16 %v164_v41, %v162_v40  ;;  %v161_v44 = vld [vmem:[%s941_s3 + $0xa0] sm:$0xff]  ;;  %v163_v45 = vld [vmem:[%s941_s3 + $0xb0] sm:$0xff]  ;;  %v166_v46 = vld [vmem:[%s941_s3 + $0xc8] sm:$0xff] }
   0xc   :  { %476 = vmatprep.subr.bf16.mxu1 %v475_v24  ;;  %v168_v47 = vld [vmem:[%s941_s3 + $0xd8] sm:$0xff]  ;;  %v489_v48 = vpack.c.bf16 %v163_v45, %v161_v44  ;;  %v165_v50 = vld [vmem:[%s941_s3 + $0xc0] sm:$0xff]  ;;  %v167_v51 = vld [vmem:[%s941_s3 + $0xd0] sm:$0xff] }
   0xd   :  { %v491_v49 = vpack.c.bf16 %v168_v47, %v166_v46  ;;  %v170_v52 = vld [vmem:[%s941_s3 + $0xe8] sm:$0xff]  ;;  %v172_v53 = vld [vmem:[%s941_s3 + $0xf8] sm:$0xff]  ;;  %v493_v54 = vpack.c.bf16 %v167_v51, %v165_v50  ;;  %v169_v56 = vld [vmem:[%s941_s3 + $0xe0] sm:$0xff] }
   0xe   :  { %423 = vmatmul.mubr.msk.f32.gmra.mrb[2].mxu0 %vm46_vm1, %v27_v29  ;;  %v495_v55 = vpack.c.bf16 %v172_v53, %v170_v52  ;;  %v171_v57 = vld [vmem:[%s941_s3 + $0xf0] sm:$0xff]  ;;  %v174_v58 = vld [vmem:[%s941_s3 + $0x108] sm:$0xff]  ;;  %v176_v59 = vld [vmem:[%s941_s3 + $0x118] sm:$0xff] }
   0xf   :  { %478 = vmatpush1.bf16.msra.mxu1 %v477_v30  ;;  %v497_v60 = vpack.c.bf16 %v171_v57, %v169_v56  ;;  %v499_v61 = vpack.c.bf16 %v176_v59, %v174_v58  ;;  %v173_v62 = vld [vmem:[%s941_s3 + $0x100] sm:$0xff]  ;;  %v175_v63 = vld [vmem:[%s941_s3 + $0x110] sm:$0xff]  ;;  %v178_v0 = vld [vmem:[%s941_s3 + $0x128] sm:$0xff] }
  0x10   :  { %480 = vmatprep.subr.bf16.mxu1 %v479_v31  ;;  %v180_v1 = vld [vmem:[%s941_s3 + $0x138] sm:$0xff]  ;;  %v501_v2 = vpack.c.bf16 %v175_v63, %v173_v62  ;;  %v177_v4 = vld [vmem:[%s941_s3 + $0x120] sm:$0xff]  ;;  %v179_v5 = vld [vmem:[%s941_s3 + $0x130] sm:$0xff] }
  0x11   :  { %v503_v3 = vpack.c.bf16 %v180_v1, %v178_v0  ;;  %v182_v6 = vld [vmem:[%s941_s3 + $0x148] sm:$0xff]  ;;  %v184_v7 = vld [vmem:[%s941_s3 + $0x158] sm:$0xff]  ;;  %v505_v8 = vpack.c.bf16 %v179_v5, %v177_v4  ;;  %v181_v10 = vld [vmem:[%s941_s3 + $0x140] sm:$0xff] }
  0x12   :  { %v507_v9 = vpack.c.bf16 %v184_v7, %v182_v6  ;;  %v183_v11 = vld [vmem:[%s941_s3 + $0x150] sm:$0xff]  ;;  %v186_v12 = vld [vmem:[%s941_s3 + $0x168] sm:$0xff]  ;;  %v188_v13 = vld [vmem:[%s941_s3 + $0x178] sm:$0xff] }
  0x13   :  { %482 = vmatpush1.bf16.msra.mxu1 %v481_v36  ;;  %v509_v14 = vpack.c.bf16 %v183_v11, %v181_v10  ;;  %v511_v15 = vpack.c.bf16 %v188_v13, %v186_v12  ;;  %v185_v16 = vld [vmem:[%s941_s3 + $0x160] sm:$0xff]  ;;  %v187_v17 = vld [vmem:[%s941_s3 + $0x170] sm:$0xff]  ;;  %v190_v18 = vld [vmem:[%s941_s3 + $0x188] sm:$0xff] }
  0x14   :  { %484 = vmatprep.subr.bf16.mxu1 %v483_v37  ;;  %v192_v19 = vld [vmem:[%s941_s3 + $0x198] sm:$0xff]  ;;  %v513_v20 = vpack.c.bf16 %v187_v17, %v185_v16  ;;  %v189_v22 = vld [vmem:[%s941_s3 + $0x180] sm:$0xff]  ;;  %v191_v23 = vld [vmem:[%s941_s3 + $0x190] sm:$0xff] }
  0x15   :  { %v515_v21 = vpack.c.bf16 %v192_v19, %v190_v18  ;;  %v194_v24 = vld [vmem:[%s941_s3 + $0x1a8] sm:$0xff]  ;;  %v196_v25 = vld [vmem:[%s941_s3 + $0x1b8] sm:$0xff]  ;;  %v517_v26 = vpack.c.bf16 %v191_v23, %v189_v22  ;;  %v193_v28 = vld [vmem:[%s941_s3 + $0x1a0] sm:$0xff]  ;;  %v36_v18 = vlaneseq }
  0x16   :  { %v519_v27 = vpack.c.bf16 %v196_v25, %v194_v24  ;;  %v195_v29 = vld [vmem:[%s941_s3 + $0x1b0] sm:$0xff]  ;;  %v198_v30 = vld [vmem:[%s941_s3 + $0x1c8] sm:$0xff]  ;;  %v200_v31 = vld [vmem:[%s941_s3 + $0x1d8] sm:$0xff] }
  0x17   :  { %486 = vmatpush1.bf16.msra.mxu1 %v485_v42  ;;  %v521_v32 = vpack.c.bf16 %v195_v29, %v193_v28  ;;  %v523_v33 = vpack.c.bf16 %v200_v31, %v198_v30  ;;  %v197_v34 = vld [vmem:[%s941_s3 + $0x1c0] sm:$0xff]  ;;  %v199_v35 = vld [vmem:[%s941_s3 + $0x1d0] sm:$0xff]  ;;  %v202_v37 = vld [vmem:[%s941_s3 + $0x1e8] sm:$0xff]  ;;  %v37_v19 = vshrl.u32 %v36_v18, 7 }
  0x18   :  { %488 = vmatprep.subr.bf16.mxu1 %v487_v43  ;;  %v525_v36 = vpack.c.bf16 %v199_v35, %v197_v34  ;;  %v204_v38 = vld [vmem:[%s941_s3 + $0x1f8] sm:$0xff]  ;;  %v201_v40 = vld [vmem:[%s941_s3 + $0x1e0] sm:$0xff]  ;;  %v203_v41 = vld [vmem:[%s941_s3 + $0x1f0] sm:$0xff] }
  0x19   :  { %v527_v39 = vpack.c.bf16 %v204_v38, %v202_v37  ;;  %v529_v42 = vpack.c.bf16 %v203_v41, %v201_v40  ;;  %v314_v43 = vld [vmem:[%s943_s5 + $0x80] sm:$0xff]  ;;  %v315_v44 = vld [vmem:[%s943_s5 + $0x88] sm:$0xff]  ;;  %v300_v52 = vld [vmem:[%s943_s5 + $0x10] sm:$0xff]  ;;  %v42_v22 = vsub.s32 1, %v37_v19 }
  0x1a   :  { %v298_v45 = vld [vmem:[%s943_s5] sm:$0xff]  ;;  %v531_v46 = vpack.c.bf16 %v315_v44, %v314_v43  ;;  %v299_v47 = vld [vmem:[%s943_s5 + $0x8] sm:$0xff]  ;;  %v301_v53 = vld [vmem:[%s943_s5 + $0x18] sm:$0xff] }
  0x1b   :  { %490 = vmatpush1.bf16.msra.mxu1 %v489_v48  ;;  %v316_v48 = vld [vmem:[%s943_s5 + $0x90] sm:$0xff]  ;;  %v533_v50 = vpack.c.bf16 %v299_v47, %v298_v45  ;;  %v537_v56 = vpack.c.bf16 %v301_v53, %v300_v52  ;;  %v302_v58 = vld [vmem:[%s943_s5 + $0x20] sm:$0xff]  ;;  %v303_v59 = vld [vmem:[%s943_s5 + $0x28] sm:$0xff] }
  0x1c   :  { %492 = vmatprep.subr.bf16.mxu1 %v491_v49  ;;  %v317_v49 = vld [vmem:[%s943_s5 + $0x98] sm:$0xff]  ;;  %532 = vmatprep.subr.bf16.mxu0 %v531_v46  ;;  %v541_v62 = vpack.c.bf16 %v303_v59, %v302_v58  ;;  %v304_v0 = vld [vmem:[%s943_s5 + $0x30] sm:$0xff]  ;;  %v306_v6 = vld [vmem:[%s943_s5 + $0x40] sm:$0xff] }
  0x1d   :  { %v535_v51 = vpack.c.bf16 %v317_v49, %v316_v48  ;;  %534 = vmatpush3.bf16.msra.mxu0 %v533_v50  ;;  %v305_v1 = vld [vmem:[%s943_s5 + $0x38] sm:$0xff]  ;;  %v307_v7 = vld [vmem:[%s943_s5 + $0x48] sm:$0xff]  ;;  %v308_v12 = vld [vmem:[%s943_s5 + $0x50] sm:$0xff] }
  0x1e   :  { %v545_v4 = vpack.c.bf16 %v305_v1, %v304_v0  ;;  %v549_v10 = vpack.c.bf16 %v307_v7, %v306_v6  ;;  %v309_v13 = vld [vmem:[%s943_s5 + $0x58] sm:$0xff]  ;;  %v310_v37 = vld [vmem:[%s943_s5 + $0x60] sm:$0xff]  ;;  %v311_v38 = vld [vmem:[%s943_s5 + $0x68] sm:$0xff] }
  0x1f   :  { %494 = vmatpush1.bf16.msra.mxu1 %v493_v54  ;;  %v318_v54 = vld [vmem:[%s943_s5 + $0xa0] sm:$0xff]  ;;  %536 = vmatprep.subr.bf16.mxu0 %v535_v51  ;;  %v553_v16 = vpack.c.bf16 %v309_v13, %v308_v12  ;;  %v328_v40 = vld [vmem:[%s943_s5 + $0xf0] sm:$0xff]  ;;  %v329_v41 = vld [vmem:[%s943_s5 + $0xf8] sm:$0xff] }
  0x20   :  { %496 = vmatprep.subr.bf16.mxu1 %v495_v55  ;;  %v319_v55 = vld [vmem:[%s943_s5 + $0xa8] sm:$0xff]  ;;  %v312_v43 = vld [vmem:[%s943_s5 + $0x70] sm:$0xff]  ;;  %v313_v44 = vld [vmem:[%s943_s5 + $0x78] sm:$0xff] }
  0x21   :  { %v539_v57 = vpack.c.bf16 %v319_v55, %v318_v54  ;;  %538 = vmatpush3.bf16.msra.mxu0 %v537_v56  ;;  %v561_v45 = vpack.c.bf16 %v313_v44, %v312_v43  ;;  %v205_v46 = vld [vmem:[%s945_s4] sm:$0x3] }
  0x22   :  { %v214_v48 = vrot.slane %v205_v46, %v42_v22 }
  0x23   :  { %498 = vmatpush1.bf16.msra.mxu1 %v497_v60  ;;  %v320_v60 = vld [vmem:[%s943_s5 + $0xb0] sm:$0xff]  ;;  %540 = vmatprep.subr.bf16.mxu0 %v539_v57 }
  0x24   :  { %500 = vmatprep.subr.bf16.mxu1 %v499_v61  ;;  %v321_v61 = vld [vmem:[%s943_s5 + $0xb8] sm:$0xff] }
  0x25   :  { %v543_v63 = vpack.c.bf16 %v321_v61, %v320_v60  ;;  %542 = vmatpush3.bf16.msra.mxu0 %v541_v62  ;;  %v424_v62 = vld [vmem:[%s946_s6] ss:$0 sm:$0xff] }
  0x27   :  { %502 = vmatpush1.bf16.msra.mxu1 %v501_v2  ;;  %v322_v2 = vld [vmem:[%s943_s5 + $0xc0] sm:$0xff]  ;;  %544 = vmatprep.subr.bf16.mxu0 %v543_v63 }
  0x28   :  { %504 = vmatprep.subr.bf16.mxu1 %v503_v3  ;;  %v323_v3 = vld [vmem:[%s943_s5 + $0xc8] sm:$0xff] }
  0x29   :  { %v547_v5 = vpack.c.bf16 %v323_v3, %v322_v2  ;;  %546 = vmatpush3.bf16.msra.mxu0 %v545_v4 }
  0x2b   :  { %506 = vmatpush1.bf16.msra.mxu1 %v505_v8  ;;  %v324_v8 = vld [vmem:[%s943_s5 + $0xd0] sm:$0xff]  ;;  %548 = vmatprep.subr.bf16.mxu0 %v547_v5 }
  0x2c   :  { %508 = vmatprep.subr.bf16.mxu1 %v507_v9  ;;  %v325_v9 = vld [vmem:[%s943_s5 + $0xd8] sm:$0xff] }
  0x2d   :  { %v551_v11 = vpack.c.bf16 %v325_v9, %v324_v8  ;;  %550 = vmatpush3.bf16.msra.mxu0 %v549_v10 }
  0x2f   :  { %510 = vmatpush1.bf16.msra.mxu1 %v509_v14  ;;  %v326_v14 = vld [vmem:[%s943_s5 + $0xe0] sm:$0xff]  ;;  %552 = vmatprep.subr.bf16.mxu0 %v551_v11 }
  0x30   :  { %512 = vmatprep.subr.bf16.mxu1 %v511_v15  ;;  %v327_v15 = vld [vmem:[%s943_s5 + $0xe8] sm:$0xff] }
  0x31   :  { %v555_v17 = vpack.c.bf16 %v327_v15, %v326_v14  ;;  %554 = vmatpush3.bf16.msra.mxu0 %v553_v16 }
  0x33   :  { %514 = vmatpush1.bf16.msra.mxu1 %v513_v20  ;;  %556 = vmatprep.subr.bf16.mxu0 %v555_v17  ;;  %v38_v20 = vsub.s32 0, %v37_v19 }
  0x34   :  { %516 = vmatprep.subr.bf16.mxu1 %v515_v21  ;;  %v34_v21 = vld [vmem:[%s944_s2] sm:$0x3] }
  0x35   :  { %v39_v23 = vrot.slane %v34_v21, %v38_v20  ;;  %v43_v24 = vrot.slane %v34_v21, %v42_v22  ;;  %v210_v47 = vrot.slane %v205_v46, %v38_v20 }
  0x37   :  { %518 = vmatpush1.bf16.msra.mxu1 %v517_v26 }
  0x38   :  { %520 = vmatprep.subr.bf16.mxu1 %v519_v27 }
  0x3b   :  { %522 = vmatpush1.bf16.msra.mxu1 %v521_v32 }
  0x3c   :  { %524 = vmatprep.subr.bf16.mxu1 %v523_v33 }
  0x3f   :  { %526 = vmatpush1.bf16.msra.mxu1 %v525_v36 }
  0x40   :  { %528 = vmatprep.subr.bf16.mxu1 %v527_v39  ;;  %v557_v39 = vpack.c.bf16 %v311_v38, %v310_v37 }
  0x42   :  { %558 = vmatpush3.bf16.msra.mxu0 %v557_v39 }
  0x43   :  { %530 = vmatpush1.bf16.msra.mxu1 %v529_v42  ;;  %v559_v42 = vpack.c.bf16 %v329_v41, %v328_v40 }
  0x45   :  { %560 = vmatprep.subr.bf16.mxu0 %v559_v42 }
  0x46   :  { %562 = vmatpush3.bf16.msra.mxu0 %v561_v45 }
  0xdd   :  { %v126_v25 = vpop.f32.mrb[0].mxu0 }
  0xde   :  { %v127_v26 = vadd.f32 %v126_v25, %v39_v23  ;;  %v128_v27 = vpop.f32.mrb[1].mxu0 }
  0xdf   :  { %v129_v28 = vadd.f32 %v128_v27, %v43_v24 }
  0xe0   :  { %v137_v31 = vmax.f32 %v127_v26, 0.0 }
  0xe1   :  { %v132_v29 = vpop.f32.mrb[2].mxu0  ;;  %v138_v30 = vmax.f32 %v129_v28, 0.0 }
  0xe2   :  { %v133_v32 = vadd.f32 %v132_v29, %v39_v23  ;;  %v134_v33 = vpop.f32.mrb[3].mxu0 }
  0xe3   :  { %v135_v34 = vadd.f32 %v134_v33, %v43_v24  ;;  %281 = vmatprep.mubr.f32.mxu1 %v138_v30 }
  0xe4   :  { %282 = vmatmul.mubr.f32.vlgmr.msra.gmra.mrb[0].mxu1 %v137_v31  ;;  %v139_v36 = vmax.f32 %v133_v32, 0.0 }
  0xe5   :  { %v140_v35 = vmax.f32 %v135_v34, 0.0 }
  0xe7   :  { %287 = vmatprep.mubr.f32.mxu1 %v140_v35 }
  0xe8   :  { %288 = vmatmul.mubr.f32.gmra.mrb[2].mxu1 %v139_v36 }
 0x1b7   :  { %v283_v49 = vpop.f32.mrb[0].mxu1 }
 0x1b8   :  { %v284_v50 = vadd.f32 %v283_v49, %v210_v47  ;;  %v285_v51 = vpop.f32.mrb[1].mxu1 }
 0x1b9   :  { %v286_v52 = vadd.f32 %v285_v51, %v214_v48 }
 0x1ba   :  { %v294_v55 = vmax.f32 %v284_v50, 0.0 }
 0x1bb   :  { %v295_v53 = vmax.f32 %v286_v52, 0.0  ;;  %v289_v54 = vpop.f32.mrb[2].mxu1 }
 0x1bc   :  { %v290_v56 = vadd.f32 %v289_v54, %v210_v47  ;;  %v291_v57 = vpop.f32.mrb[3].mxu1 }
 0x1bd   :  { %v292_v58 = vadd.f32 %v291_v57, %v214_v48  ;;  %401 = vmatprep.mubr.f32.mxu0 %v295_v53 }
 0x1be   :  { %402 = vmatmul.mubr.f32.vlgmr.msra.gmra.mrb[4].mxu0 %v294_v55  ;;  %v296_v60 = vmax.f32 %v290_v56, 0.0 }
 0x1bf   :  { %v297_v59 = vmax.f32 %v292_v58, 0.0 }
 0x1c1   :  { %406 = vmatprep.mubr.f32.mxu0 %v297_v59 }
 0x1c2   :  { %407 = vmatmul.mubr.f32.gmra.mrb[6].mxu0 %v296_v60 }
 0x291   :  { %v457_v61 = vpop.f32.mrb[4].mxu0 }
 0x292   :  { %v458_v63 = vpop.f32.mrb[5].mxu0 }
 0x293   :  { %v459_v0 = vadd.f32 %v458_v63, %v457_v61 }
 0x295   :  { %v404_v1 = vadd.f32 %v459_v0, %v424_v62  ;;  %v460_v2 = vpop.f32.mrb[6].mxu0 }
 0x296   :  { %v461_v3 = vpop.f32.mrb[7].mxu0 }
 0x297   :  { %564 = vtanh.f32 %v404_v1  ;;  %v462_v4 = vadd.f32 %v461_v3, %v460_v2 }
 0x299   :  { %v409_v5 = vadd.f32 %v462_v4, %v424_v62 }
 0x29b   :  { %566 = vtanh.f32 %v409_v5 }
 0x2a1   :  { %v565_v6 = vpop.eup %564 }
 0x2a2   :  { %414 = vst [vmem:[%s947_s7] sm:$0xff] %v565_v6 }
 0x2a5   :  { %v567_v7 = vpop.eup %566 }
 0x2a6   :  { %415 = vst [vmem:[%s947_s7 + $0x8] sm:$0xff] %v567_v7 }

</bundles_post_ra>
